<compile_context>
chip_gen: v5e
topology: v5e:2x2
jax: 0.10.0
libtpu: 0.0.40
codegen_flags: <defaults>
</compile_context>

<pallas_src>
import math
import jax
import jax.numpy as jnp
from jax.experimental import pallas as pl
from jax.experimental.pallas import tpu as pltpu


def _round_up(x: int, m: int) -> int:
    return (x + m - 1) // m * m


def _pick_tile(dim_pad: int, unit: int, t_max: int) -> int:
    """Largest multiple of `unit` that divides `dim_pad` and is <= t_max."""
    if dim_pad <= t_max:
        return dim_pad
    blocks = dim_pad // unit
    for d in range(t_max // unit, 0, -1):
        if blocks % d == 0:
            return d * unit
    return unit


def linear_kernel(x_ref, w_ref, b_ref, o_ref):
    k = pl.program_id(2)

    @pl.when(k == 0)
    def _init():
        # The output tile is resident across the K axis (index_map ignores k),
        # so it doubles as the f32 accumulator.  Seeding it with the broadcast
        # bias removes both the zeros-init pass and the bias epilogue.
        o_ref[...] = jnp.broadcast_to(b_ref[...], o_ref.shape)

    # Pure MXU work: bf16 (or f32) operands, f32 accumulation into o_ref.
    o_ref[...] += jnp.dot(
        x_ref[...], w_ref[...], preferred_element_type=jnp.float32
    )


def linear_forward(
    x,
    weight,
    bias,
    *,
    tm_max=1024,
    tn_max=2048,
    tk_max=512,
    use_bf16_operands=True,
):
    """x: (B, in_f); weight: (in_f, out_f); bias: (out_f, 1). Returns f32 (B, out_f)."""
    M, K = x.shape
    K_w, N = weight.shape
    assert K == K_w, "in_features mismatch"
    assert bias.shape == (N, 1), "bias must be (out_features, 1)"

    out_dtype = jnp.float32
    op_dtype = jnp.bfloat16 if use_bf16_operands else jnp.float32

    # Pad only to hardware alignment (8 sublanes / 128 lanes), not to tile
    # multiples, so padded work is bounded by < 1 vreg row/lane per dim.
    M_pad = _round_up(M, 8)
    N_pad = _round_up(N, 128)
    K_pad = _round_up(K, 128)

    # Tiles must divide the padded dims (no pad-to-tile work inflation).
    tm = _pick_tile(M_pad, 8, tm_max)
    tn = _pick_tile(N_pad, 128, tn_max)
    tk = _pick_tile(K_pad, 128, tk_max)

    # v7x has 2 TensorCores sharded over the "parallel" grid axes; avoid a
    # degenerate 1x1xK grid by splitting N when it can stay 128-aligned.
    if (M_pad // tm) * (N_pad // tn) == 1 and tn % 256 == 0:
        tn //= 2

    # Conditional glue: skip casts / pads when the input is already usable.
    def _prep(a, rows, cols, rpad, cpad, dtype):
        if a.dtype != dtype:
            a = a.astype(dtype)
        if rpad != rows or cpad != cols:
            a = jnp.pad(a, ((0, rpad - rows), (0, cpad - cols)))
        return a

    x_p = _prep(x, M, K, M_pad, K_pad, op_dtype)
    w_p = _prep(weight, K, N, K_pad, N_pad, op_dtype)
    b_row = _prep(bias.reshape(1, N), 1, N, 1, N_pad, out_dtype)

    grid = (M_pad // tm, N_pad // tn, K_pad // tk)

    # Double-buffered VMEM footprint: 2x (x tile + W tile + bias row + out tile).
    op_bytes = jnp.dtype(op_dtype).itemsize
    footprint = 2 * (tm * tk * op_bytes + tk * tn * op_bytes + tn * 4 + tm * tn * 4)
    # >= 32 MiB (default scoped limit) for headroom, <= 48 MiB (v7x-safe).
    vmem_limit = min(max(int(footprint * 1.5) + (1 << 20), 32 << 20), 48 << 20)

    # TODO(synk): if profiling shows the W-tile DMA exposed at large tn, bump
    # the W BlockSpec to pipeline_mode=pl.Buffered(3) (budget vs v7x 64 MiB).
    out_padded = pl.pallas_call(
        linear_kernel,
        out_shape=jax.ShapeDtypeStruct((M_pad, N_pad), out_dtype),
        grid_spec=pltpu.PrefetchScalarGridSpec(
            num_scalar_prefetch=0,
            grid=grid,
            in_specs=[
                pl.BlockSpec((tm, tk), lambda i, j, k: (i, k)),   # x tile
                pl.BlockSpec((tk, tn), lambda i, j, k: (k, j)),   # W tile
                pl.BlockSpec((1, tn), lambda i, j, k: (0, j)),    # bias row
            ],
            out_specs=pl.BlockSpec((tm, tn), lambda i, j, k: (i, j)),
        ),
        compiler_params=pltpu.CompilerParams(
            dimension_semantics=("parallel", "parallel", "arbitrary"),
            vmem_limit_bytes=vmem_limit,
        ),
    )(x_p, w_p, b_row)

    if M_pad != M or N_pad != N:
        out_padded = out_padded[:M, :N]
    return out_padded


if __name__ == "__main__":
    # Small shapes implied by the module: a 2-D activation (batch, in_features).
    B, IN_F, OUT_F = 8, 32, 64

    key = jax.random.PRNGKey(0)
    kx, kw, kb = jax.random.split(key, 3)

    # Deterministic parameter init mirroring the module's __init__:
    #   stdv = 1/sqrt(out_features); uniform(-stdv, stdv)
    stdv = 1.0 / math.sqrt(OUT_F)
    weight = jax.random.uniform(kw, (IN_F, OUT_F), jnp.float32, -stdv, stdv)
    bias = jax.random.uniform(kb, (OUT_F, 1), jnp.float32, -stdv, stdv)

    x = jax.random.normal(kx, (B, IN_F), jnp.float32)

    # Reference semantics of the numpy forward:
    #   np.matmul(x, W) + np.transpose(np.repeat(bias, B, axis=1))
    y_ref = x @ weight + bias.T

    # Fast path: bf16 operands on the MXU, f32 accumulation / output.
    y = jax.block_until_ready(linear_forward(x, weight, bias))
    assert y.shape == (B, OUT_F)
    assert y.dtype == jnp.float32
    assert jnp.allclose(y, y_ref, atol=2e-2, rtol=2e-2)

    # Exact path: f32 operands, tight tolerance (validates kernel structure).
    y_f32 = jax.block_until_ready(
        linear_forward(x, weight, bias, use_bf16_operands=False)
    )
    assert jnp.allclose(y_f32, y_ref, atol=1e-5, rtol=1e-5)

    print("KERNEL_OK")
</pallas_src>

<mosaic_0001>
module attributes {stable_mosaic.version = 11 : i64} {
  func.func @linear_kernel(%arg0: i32, %arg1: i32, %arg2: i32, %arg3: memref<8x128xbf16, #tpu.memory_space<vmem>>, %arg4: memref<128x128xbf16, #tpu.memory_space<vmem>>, %arg5: memref<1x128xf32, #tpu.memory_space<vmem>>, %arg6: memref<8x128xf32, #tpu.memory_space<vmem>>) attributes {dimension_semantics = [#tpu.dimension_semantics<parallel>, #tpu.dimension_semantics<parallel>, #tpu.dimension_semantics<arbitrary>], iteration_bounds = array<i64: 1, 1, 1>, scalar_prefetch = 0 : i64, scratch_operands = 0 : i64, tpu.core_type = #tpu.core_type<tc>, window_params = [{transform_indices = @transform_0, window_bounds = array<i64: 8, 128>}, {transform_indices = @transform_1, window_bounds = array<i64: 128, 128>}, {transform_indices = @transform_2, window_bounds = array<i64: 1, 128>}, {transform_indices = @transform_3, window_bounds = array<i64: 8, 128>}]} {
    %c0_i32 = arith.constant 0 : i32
    %0 = arith.cmpi eq, %arg2, %c0_i32 : i32
    %1 = arith.extui %0 : i1 to i32
    %c0_i32_0 = arith.constant 0 : i32
    %2 = arith.cmpi ne, %1, %c0_i32_0 : i32
    scf.if %2 {
      %c0_8 = arith.constant 0 : index
      %c0_9 = arith.constant 0 : index
      %9 = vector.load %arg5[%c0_8, %c0_9] : memref<1x128xf32, #tpu.memory_space<vmem>>, vector<1x128xf32>
      %10 = vector.shape_cast %9 : vector<1x128xf32> to vector<1x128xf32>
      %11 = vector.broadcast %10 : vector<1x128xf32> to vector<8x128xf32>
      %c0_10 = arith.constant 0 : index
      %c0_11 = arith.constant 0 : index
      %12 = vector.load %arg6[%c0_10, %c0_11] : memref<8x128xf32, #tpu.memory_space<vmem>>, vector<8x128xf32>
      tpu.vector_store %arg6[%c0_10, %c0_11], %11 {strides = array<i32>} : memref<8x128xf32, #tpu.memory_space<vmem>>, vector<8x128xf32>,
    } else {
    }
    %c0 = arith.constant 0 : index
    %c0_1 = arith.constant 0 : index
    %3 = vector.load %arg6[%c0, %c0_1] : memref<8x128xf32, #tpu.memory_space<vmem>>, vector<8x128xf32>
    %c0_2 = arith.constant 0 : index
    %c0_3 = arith.constant 0 : index
    %4 = vector.load %arg3[%c0_2, %c0_3] : memref<8x128xbf16, #tpu.memory_space<vmem>>, vector<8x128xbf16>
    %c0_4 = arith.constant 0 : index
    %c0_5 = arith.constant 0 : index
    %5 = vector.load %arg4[%c0_4, %c0_5] : memref<128x128xbf16, #tpu.memory_space<vmem>>, vector<128x128xbf16>
    %cst = arith.constant dense<0.000000e+00> : vector<8x128xf32>
    %6 = tpu.matmul %4, %5, %cst {dimension_numbers = #tpu.dot_dimension_numbers<[1], [0], [0], [1], [0, 0, 1, 1], [], []>} : vector<8x128xbf16>, vector<128x128xbf16>, vector<8x128xf32> -> vector<8x128xf32>
    %7 = arith.addf %3, %6 : vector<8x128xf32>
    %c0_6 = arith.constant 0 : index
    %c0_7 = arith.constant 0 : index
    %8 = vector.load %arg6[%c0_6, %c0_7] : memref<8x128xf32, #tpu.memory_space<vmem>>, vector<8x128xf32>
    tpu.vector_store %arg6[%c0_6, %c0_7], %7 {strides = array<i32>} : memref<8x128xf32, #tpu.memory_space<vmem>>, vector<8x128xf32>,
    return
  }
  func.func @transform_0(%arg0: i32, %arg1: i32, %arg2: i32) -> (i32, i32) {
    %c0_i32 = arith.constant 0 : i32
    return %arg0, %arg2 : i32, i32
  }
  func.func @transform_1(%arg0: i32, %arg1: i32, %arg2: i32) -> (i32, i32) {
    %c0_i32 = arith.constant 0 : i32
    return %arg2, %arg1 : i32, i32
  }
  func.func @transform_2(%arg0: i32, %arg1: i32, %arg2: i32) -> (i32, i32) {
    %c0_i32 = arith.constant 0 : i32
    %c0_i32_0 = arith.constant 0 : i32
    return %c0_i32, %arg1 : i32, i32
  }
  func.func @transform_3(%arg0: i32, %arg1: i32, %arg2: i32) -> (i32, i32) {
    %c0_i32 = arith.constant 0 : i32
    return %arg0, %arg1 : i32, i32
  }
}

</mosaic_0001>

<bundles_post_ra>
// kernel: tpu_custom_call.1
= control target key start
LH: loop header
LB: loop body
LE: loop exit
PB: predicated region body
PF: predicated region fallthrough
CT: control target
= control target key end

     0   :  { %8 = vsyncpa [#allocation3], 0  ;;  %s314_s0 = inlined_call_operand.hbm [shape: bf16[8,128], index: 0, kind: input, shape index: {}]   ;;  %s315_s1 = inlined_call_operand.hbm [shape: bf16[128,128], index: 1, kind: input, shape index: {}]   ;;  %s316_s2 = inlined_call_operand.vmem [shape: f32[1,128], index: 2, kind: input, shape index: {}]   ;;  %s317_s3 = inlined_call_operand.hbm [shape: f32[8,128], index: 3, kind: output, shape index: {}]  }
   0x1   :  { %9 = vsyncpa [#allocation6], 0 }
   0x2   :  { %10 = vsyncpa [#allocation4], 0  ;;  %s16_s14 = sshll.u32 %s314_s0, 4  ;;  %s277_s15 = smov [#allocation2]   ;;  %s17_s14 = int_to_ptr.hbm [resolvable:$true] %s16_s14 }
   0x3   :  { %s18_s16 = sshll.u32 %s277_s15, 4  ;;  %s26_s19 = sshll.u32 %s315_s1, 4  ;;  %s19_s16 = int_to_ptr.vmem [resolvable:$true] %s18_s16  ;;  %s27_s19 = int_to_ptr.hbm [resolvable:$true] %s26_s19 }
   0x4   :  { %21 = dma.hbm_to_vmem [thread:$0]  %s17_s14, 64, %s19_s16, [#allocation3]  }
   0x5   :  { %s278_s20 = smov [#allocation5]   ;;  %s279_s22 = smov 64  }
   0x6   :  { %s28_s21 = sshll.u32 %s278_s20, 4  ;;  %s280_s23 = smov 4   ;;  %s29_s21 = int_to_ptr.vmem [resolvable:$true] %s28_s21 }
   0x7   :  { %34 = dma.hbm_to_vmem [thread:$0]  %s27_s19, 1024, %s29_s21, [#allocation6], %s279_s22, %s279_s22, %s280_s23  }
   0x8   :  { %271 = dma.done.wait [#allocation3], 64  }
   0x9   :  { %272 = vsyncadd [#allocation3], 4294967232 }
   0xa   :  { %273 = dma.done.wait [#allocation6], 1024  }
   0xb   :  { %274 = vsyncadd [#allocation6], 4294966272  ;;  %v192_v0 = vld [vmem:[#allocation5 + $0x38] sm:$0xff]  ;;  %v191_v1 = vld [vmem:[#allocation5 + $0x30] sm:$0xff]  ;;  %s281_s24 = smov [#allocation7]   ;;  %s142_s28 = sshll.u32 %s317_s3, 4  ;;  %s143_s28 = int_to_ptr.hbm [resolvable:$true] %s142_s28 }
   0xc   :  { %120 = vmatpush.bf16.msra.mxu0 %v192_v0  ;;  %v190_v2 = vld [vmem:[#allocation5 + $0x28] sm:$0xff]  ;;  %v189_v3 = vld [vmem:[#allocation5 + $0x20] sm:$0xff]  ;;  %v188_v4 = vld [vmem:[#allocation5 + $0x18] sm:$0xff]  ;;  %s140_s25 = sshll.u32 %s281_s24, 4  ;;  %s141_s25 = int_to_ptr.vmem [resolvable:$true] %s140_s25 }
   0xd   :  { %v187_v5 = vld [vmem:[#allocation5 + $0x10] sm:$0xff]  ;;  %v186_v6 = vld [vmem:[#allocation5 + $0x8] sm:$0xff]  ;;  %v185_v7 = vld [vmem:[#allocation5] sm:$0xff] }
   0xe   :  { %v55_v8 = vld [vmem:[#allocation2] sm:$0xf] }
   0xf   :  { %v198_v9 = vld [vmem:[%s316_s2] ss:$0 sm:$0xff] }
  0x10   :  { %121 = vmatpush.bf16.msra.mxu0 %v191_v1 }
  0x14   :  { %122 = vmatpush.bf16.msra.mxu0 %v190_v2 }
  0x18   :  { %123 = vmatpush.bf16.msra.mxu0 %v189_v3 }
  0x1c   :  { %124 = vmatpush.bf16.msra.mxu0 %v188_v4 }
  0x20   :  { %125 = vmatpush.bf16.msra.mxu0 %v187_v5 }
  0x24   :  { %126 = vmatpush.bf16.msra.mxu0 %v186_v6 }
  0x28   :  { %127 = vmatpush.bf16.msra.mxu0 %v185_v7 }
  0x2b   :  { %128 = vmatmul.bf16.vlgmr.msra.gmra.mxu0 %v55_v8 }
  0xa8   :  { %v129_v10 = vpop.f32.mrf.mxu0 }
  0xa9   :  { %v133_v11 = vadd.f32 %v198_v9, %v129_v10 }
  0xab   :  { %134 = vst [vmem:[#allocation7] sm:$0xff] %v133_v11 }
  0xac   :  { %145 = dma.vmem_to_hbm [thread:$0]  %s141_s25, 128, %s143_s28, [#allocation4]  }
  0xb0   :  { %v131_v12 = vpop.f32.mrf.mxu0 }
  0xb1   :  { %275 = dma.done.wait [#allocation4], 128  }
  0xb2   :  { %276 = vsyncadd [#allocation4], 4294967168 }
  0xb3   :  { %150 = vsyncpa [#allocation3], 1 }
  0xb4   :  { %151 = vsyncpa [#allocation6], 1 }
  0xb5   :  { %152 = vsyncpa [#allocation4], 1 }

</bundles_post_ra>
